<compile_context>
chip_gen: v7x
topology: tpu7x:2x2x1
jax: 0.10.0
libtpu: 0.0.40
codegen_flags: <defaults>
</compile_context>

<pallas_src>
import jax
import jax.numpy as jnp
from jax.experimental import pallas as pl
from jax.experimental.pallas import tpu as pltpu

FEATURE_DIM = 256
NUM_ACTIONS = 6
ACTION_PAD = 128        # logits padded to a full lane width
HIDDEN2_PAD = 128       # policy hidden 126 -> 128
NEG_INF = -1e9


def _round_up(n, m):
    return ((n + m - 1) // m) * m


def policy_kernel(x_ref,
                  w1_ref, b1_ref,           # fused layer 1 (policy|value): (F,512)/(1,512)
                  w2p_ref, b2p_ref,         # policy layer 2: (256,128)/(1,128)
                  w3p_ref, b3p_ref,         # policy layer 3: (128,128)/(1,128)
                  w2v_ref, b2v_ref,         # value layer 2 as row vector: (1,256)/(1,1)
                  logits_ref, logp_ref, value_ref):
    x = x_ref[...]                                              # (TM, F) bf16

    # ---- fused layer 1: [policy | value] = relu(x @ W1 + b1), f32 accumulation
    h1 = jnp.dot(x, w1_ref[...], preferred_element_type=jnp.float32) + b1_ref[...]
    h1 = jnp.maximum(h1, 0.0)                                   # (TM, 512) f32
    hp = h1[:, :256]                                            # policy hidden
    hv = h1[:, 256:]                                            # value hidden

    # ---- policy layer 2 (126 -> 128 padded lanes) + ReLU
    h2 = jnp.dot(hp.astype(jnp.bfloat16), w2p_ref[...],
                 preferred_element_type=jnp.float32) + b2p_ref[...]
    h2 = jnp.maximum(h2, 0.0)                                   # (TM, 128) f32

    # ---- policy layer 3 -> padded logits; padded lanes carry a -1e9 bias
    logits = jnp.dot(h2.astype(jnp.bfloat16), w3p_ref[...],
                     preferred_element_type=jnp.float32) + b3p_ref[...]
    logits_ref[...] = logits                                    # (TM, 128) f32, lane-dense

    # ---- Categorical(logits=...): normalized log-probabilities
    m = jnp.max(logits, axis=-1, keepdims=True)
    lse = jnp.log(jnp.sum(jnp.exp(logits - m), axis=-1, keepdims=True)) + m
    logp_ref[...] = logits - lse

    # ---- value head layer 2: N=1 matmul done as VPU multiply + lane reduce (XLU)
    val = jnp.sum(hv * w2v_ref[...], axis=-1, keepdims=True) + b2v_ref[...]   # (TM, 1)
    value_ref[...] = jnp.broadcast_to(val, value_ref.shape)    # lane-dense store


def policy_forward(x, kparams, *, num_actions=NUM_ACTIONS, tile_m=512):
    """Returns (logits, normalized_log_probs, value) where value has shape [B]."""
    B, F = x.shape

    # Batch tile: multiple of 8 sublanes, capped at tile_m; pad B up to a whole
    # number of tiles so every block is full (aligned, dense loads/stores).
    tm = min(tile_m, _round_up(B, 8))
    b_pad = _round_up(B, tm)
    n_tiles = b_pad // tm

    xb = x.astype(jnp.bfloat16)                  # halve HBM/VMEM traffic for x
    if b_pad != B:
        xb = jnp.pad(xb, ((0, b_pad - B), (0, 0)))

    args = (xb,
            kparams["w1"], kparams["b1"],
            kparams["w2p"], kparams["b2p"],
            kparams["w3p"], kparams["b3p"],
            kparams["w2v"], kparams["b2v"])

    def resident(a):     # whole array, constant block index -> stays in VMEM
        return pl.BlockSpec(a.shape, lambda i: (0, 0))

    in_specs = ([pl.BlockSpec((tm, F), lambda i: (i, 0))]
                + [resident(a) for a in args[1:]])

    out_shapes = (jax.ShapeDtypeStruct((b_pad, ACTION_PAD), jnp.float32),
                  jax.ShapeDtypeStruct((b_pad, ACTION_PAD), jnp.float32),
                  jax.ShapeDtypeStruct((b_pad, 128), jnp.float32))
    out_specs = (pl.BlockSpec((tm, ACTION_PAD), lambda i: (i, 0)),
                 pl.BlockSpec((tm, ACTION_PAD), lambda i: (i, 0)),
                 pl.BlockSpec((tm, 128), lambda i: (i, 0)))

    logits_p, logp_p, value_p = pl.pallas_call(
        policy_kernel,
        grid=(n_tiles,),
        in_specs=in_specs,
        out_specs=out_specs,
        out_shape=out_shapes,
        compiler_params=pltpu.CompilerParams(
            dimension_semantics=("parallel",)),   # megacore-shard batch on v7x
    )(*args)

    logits = logits_p[:B, :num_actions]
    logp = logp_p[:B, :num_actions]
    value = value_p[:B, 0]
    return logits, logp, value


def init_params(key, feature_dim=FEATURE_DIM, num_actions=NUM_ACTIONS):
    """PyTorch-equivalent parameters, stored as (in_features, out_features)."""
    ks = jax.random.split(key, 10)

    def lin(kw, kb, fan_in, fan_out):
        lim = 1.0 / jnp.sqrt(jnp.float32(fan_in))
        w = jax.random.uniform(kw, (fan_in, fan_out), jnp.float32, -lim, lim)
        b = jax.random.uniform(kb, (1, fan_out), jnp.float32, -lim, lim)
        return w, b

    w1p, b1p = lin(ks[0], ks[1], feature_dim, 256)
    w2p, b2p = lin(ks[2], ks[3], 256, 126)
    w3p, b3p = lin(ks[4], ks[5], 126, num_actions)
    w1v, b1v = lin(ks[6], ks[7], feature_dim, 256)
    # NOTE: the spec's value head is nn.Sequential(Linear(feature_dim,256), ReLU,
    # Linear(feature_dim,1)); like the PyTorch module it only works when
    # feature_dim == 256 (the second Linear consumes the 256-wide hidden).
    w2v, b2v = lin(ks[8], ks[9], feature_dim, 1)

    return dict(w1p=w1p, b1p=b1p, w2p=w2p, b2p=b2p, w3p=w3p, b3p=b3p,
                w1v=w1v, b1v=b1v, w2v=w2v, b2v=b2v)


def prepare_params(params, num_actions=NUM_ACTIONS):
    """Fuse / pad / cast raw parameters into the kernel layout (done once)."""
    # fused layer 1: [policy | value] output columns
    w1 = jnp.concatenate([params["w1p"], params["w1v"]], axis=1).astype(jnp.bfloat16)
    b1 = jnp.concatenate([params["b1p"], params["b1v"]], axis=1)              # f32 (1,512)

    # policy layer 2: 126 -> 128 lanes (zero pad)
    w2p = jnp.pad(params["w2p"], ((0, 0), (0, HIDDEN2_PAD - 126))).astype(jnp.bfloat16)
    b2p = jnp.pad(params["b2p"], ((0, 0), (0, HIDDEN2_PAD - 126)))            # f32 (1,128)

    # policy layer 3: (126, A) -> (128, 128); padded logit lanes get -1e9 bias
    w3p = jnp.pad(params["w3p"],
                  ((0, HIDDEN2_PAD - 126), (0, ACTION_PAD - num_actions))
                  ).astype(jnp.bfloat16)
    b3p = jnp.pad(params["b3p"], ((0, 0), (0, ACTION_PAD - num_actions)),
                  constant_values=NEG_INF)                                    # f32 (1,128)

    # value layer 2 as a (1, 256) row for VPU multiply + lane reduce (kept f32)
    w2v = params["w2v"].T                                                     # f32 (1,256)
    b2v = params["b2v"]                                                       # f32 (1,1)

    return dict(w1=w1, b1=b1, w2p=w2p, b2p=b2p, w3p=w3p, b3p=b3p,
                w2v=w2v, b2v=b2v)


def reference_forward(x, params):
    """Pure-JAX f32 reference of the PyTorch module."""
    h = jnp.maximum(x @ params["w1p"] + params["b1p"], 0.0)
    h = jnp.maximum(h @ params["w2p"] + params["b2p"], 0.0)
    logits = h @ params["w3p"] + params["b3p"]
    logp = jax.nn.log_softmax(logits, axis=-1)
    v = jnp.maximum(x @ params["w1v"] + params["b1v"], 0.0)
    value = (v @ params["w2v"] + params["b2v"])[:, 0]
    return logits, logp, value


if __name__ == "__main__":
    key = jax.random.PRNGKey(0)
    k_x, k_p = jax.random.split(key)

    B = 8
    x = jax.random.normal(k_x, (B, FEATURE_DIM), dtype=jnp.float32)
    params = init_params(k_p)
    kparams = prepare_params(params)

    logits, logp, value = policy_forward(x, kparams)
    jax.block_until_ready((logits, logp, value))

    # sanity: shapes, normalized probabilities, and agreement with f32 reference
    assert logits.shape == (B, NUM_ACTIONS)
    assert logp.shape == (B, NUM_ACTIONS)
    assert value.shape == (B,)
    assert bool(jnp.allclose(jnp.sum(jnp.exp(logp), axis=-1), 1.0, atol=1e-4))

    ref_logits, ref_logp, ref_value = reference_forward(x, params)
    assert bool(jnp.allclose(logits, ref_logits, atol=1e-1))
    assert bool(jnp.allclose(logp, ref_logp, atol=1e-1))
    assert bool(jnp.allclose(value, ref_value, atol=1e-1))

    print("KERNEL_OK")
</pallas_src>

<mosaic_0001>
module attributes {stable_mosaic.version = 11 : i64} {
  func.func @policy_kernel(%arg0: i32, %arg1: memref<8x256xbf16, #tpu.memory_space<vmem>>, %arg2: memref<256x512xbf16, #tpu.memory_space<vmem>>, %arg3: memref<1x512xf32, #tpu.memory_space<vmem>>, %arg4: memref<256x128xbf16, #tpu.memory_space<vmem>>, %arg5: memref<1x128xf32, #tpu.memory_space<vmem>>, %arg6: memref<128x128xbf16, #tpu.memory_space<vmem>>, %arg7: memref<1x128xf32, #tpu.memory_space<vmem>>, %arg8: memref<1x256xf32, #tpu.memory_space<vmem>>, %arg9: memref<1x1xf32, #tpu.memory_space<vmem>>, %arg10: memref<8x128xf32, #tpu.memory_space<vmem>>, %arg11: memref<8x128xf32, #tpu.memory_space<vmem>>, %arg12: memref<8x128xf32, #tpu.memory_space<vmem>>) attributes {dimension_semantics = [#tpu.dimension_semantics<parallel>], iteration_bounds = array<i64: 1>, scalar_prefetch = 0 : i64, scratch_operands = 0 : i64, tpu.core_type = #tpu.core_type<tc>, window_params = [{transform_indices = @transform_0, window_bounds = array<i64: 8, 256>}, {pipeline_mode = #tpu.pipeline_mode<synchronous>, transform_indices = @transform_1, window_bounds = array<i64: 256, 512>}, {pipeline_mode = #tpu.pipeline_mode<synchronous>, transform_indices = @transform_2, window_bounds = array<i64: 1, 512>}, {pipeline_mode = #tpu.pipeline_mode<synchronous>, transform_indices = @transform_3, window_bounds = array<i64: 256, 128>}, {pipeline_mode = #tpu.pipeline_mode<synchronous>, transform_indices = @transform_4, window_bounds = array<i64: 1, 128>}, {pipeline_mode = #tpu.pipeline_mode<synchronous>, transform_indices = @transform_5, window_bounds = array<i64: 128, 128>}, {pipeline_mode = #tpu.pipeline_mode<synchronous>, transform_indices = @transform_6, window_bounds = array<i64: 1, 128>}, {pipeline_mode = #tpu.pipeline_mode<synchronous>, transform_indices = @transform_7, window_bounds = array<i64: 1, 256>}, {pipeline_mode = #tpu.pipeline_mode<synchronous>, transform_indices = @transform_8, window_bounds = array<i64: 1, 1>}, {transform_indices = @transform_9, window_bounds = array<i64: 8, 128>}, {transform_indices = @transform_10, window_bounds = array<i64: 8, 128>}, {transform_indices = @transform_11, window_bounds = array<i64: 8, 128>}]} {
    %c0 = arith.constant 0 : index
    %c0_0 = arith.constant 0 : index
    %0 = vector.load %arg1[%c0, %c0_0] : memref<8x256xbf16, #tpu.memory_space<vmem>>, vector<8x256xbf16>
    %c0_1 = arith.constant 0 : index
    %c0_2 = arith.constant 0 : index
    %1 = vector.load %arg2[%c0_1, %c0_2] : memref<256x512xbf16, #tpu.memory_space<vmem>>, vector<256x512xbf16>
    %cst = arith.constant dense<0.000000e+00> : vector<8x512xf32>
    %2 = tpu.matmul %0, %1, %cst {dimension_numbers = #tpu.dot_dimension_numbers<[1], [0], [0], [1], [0, 0, 1, 1], [], []>} : vector<8x256xbf16>, vector<256x512xbf16>, vector<8x512xf32> -> vector<8x512xf32>
    %c0_3 = arith.constant 0 : index
    %c0_4 = arith.constant 0 : index
    %3 = vector.load %arg3[%c0_3, %c0_4] : memref<1x512xf32, #tpu.memory_space<vmem>>, vector<1x512xf32>
    %4 = vector.broadcast %3 : vector<1x512xf32> to vector<8x512xf32>
    %5 = arith.addf %2, %4 : vector<8x512xf32>
    %cst_5 = arith.constant 0.000000e+00 : f32
    %6 = vector.broadcast %cst_5 : f32 to vector<8x512xf32>
    %7 = arith.maximumf %5, %6 : vector<8x512xf32>
    %8 = vector.extract_strided_slice %7 {offsets = [0, 0], sizes = [8, 256], strides = [1, 1]} : vector<8x512xf32> to vector<8x256xf32>
    %9 = vector.extract_strided_slice %7 {offsets = [0, 256], sizes = [8, 256], strides = [1, 1]} : vector<8x512xf32> to vector<8x256xf32>
    %10 = arith.truncf %8 : vector<8x256xf32> to vector<8x256xbf16>
    %c0_6 = arith.constant 0 : index
    %c0_7 = arith.constant 0 : index
    %11 = vector.load %arg4[%c0_6, %c0_7] : memref<256x128xbf16, #tpu.memory_space<vmem>>, vector<256x128xbf16>
    %cst_8 = arith.constant dense<0.000000e+00> : vector<8x128xf32>
    %12 = tpu.matmul %10, %11, %cst_8 {dimension_numbers = #tpu.dot_dimension_numbers<[1], [0], [0], [1], [0, 0, 1, 1], [], []>} : vector<8x256xbf16>, vector<256x128xbf16>, vector<8x128xf32> -> vector<8x128xf32>
    %c0_9 = arith.constant 0 : index
    %c0_10 = arith.constant 0 : index
    %13 = vector.load %arg5[%c0_9, %c0_10] : memref<1x128xf32, #tpu.memory_space<vmem>>, vector<1x128xf32>
    %14 = vector.broadcast %13 : vector<1x128xf32> to vector<8x128xf32>
    %15 = arith.addf %12, %14 : vector<8x128xf32>
    %cst_11 = arith.constant 0.000000e+00 : f32
    %16 = vector.broadcast %cst_11 : f32 to vector<8x128xf32>
    %17 = arith.maximumf %15, %16 : vector<8x128xf32>
    %18 = arith.truncf %17 : vector<8x128xf32> to vector<8x128xbf16>
    %c0_12 = arith.constant 0 : index
    %c0_13 = arith.constant 0 : index
    %19 = vector.load %arg6[%c0_12, %c0_13] : memref<128x128xbf16, #tpu.memory_space<vmem>>, vector<128x128xbf16>
    %cst_14 = arith.constant dense<0.000000e+00> : vector<8x128xf32>
    %20 = tpu.matmul %18, %19, %cst_14 {dimension_numbers = #tpu.dot_dimension_numbers<[1], [0], [0], [1], [0, 0, 1, 1], [], []>} : vector<8x128xbf16>, vector<128x128xbf16>, vector<8x128xf32> -> vector<8x128xf32>
    %c0_15 = arith.constant 0 : index
    %c0_16 = arith.constant 0 : index
    %21 = vector.load %arg7[%c0_15, %c0_16] : memref<1x128xf32, #tpu.memory_space<vmem>>, vector<1x128xf32>
    %22 = vector.broadcast %21 : vector<1x128xf32> to vector<8x128xf32>
    %23 = arith.addf %20, %22 : vector<8x128xf32>
    %c0_17 = arith.constant 0 : index
    %c0_18 = arith.constant 0 : index
    %24 = vector.load %arg10[%c0_17, %c0_18] : memref<8x128xf32, #tpu.memory_space<vmem>>, vector<8x128xf32>
    tpu.vector_store %arg10[%c0_17, %c0_18], %23 {strides = array<i32>} : memref<8x128xf32, #tpu.memory_space<vmem>>, vector<8x128xf32>,
    %cst_19 = arith.constant dense<0xFF800000> : vector<8xf32>
    %25 = vector.multi_reduction <maximumf>, %23, %cst_19 [1] : vector<8x128xf32> to vector<8xf32>
    %26 = vector.shape_cast %25 : vector<8xf32> to vector<8x1xf32>
    %27 = vector.broadcast %26 : vector<8x1xf32> to vector<8x128xf32>
    %28 = arith.subf %23, %27 : vector<8x128xf32>
    %29 = math.exp %28 : vector<8x128xf32>
    %cst_20 = arith.constant dense<0.000000e+00> : vector<8xf32>
    %30 = vector.multi_reduction <add>, %29, %cst_20 [1] : vector<8x128xf32> to vector<8xf32>
    %31 = vector.shape_cast %30 : vector<8xf32> to vector<8x1xf32>
    %32 = math.log %31 : vector<8x1xf32>
    %33 = arith.addf %32, %26 : vector<8x1xf32>
    %34 = vector.broadcast %33 : vector<8x1xf32> to vector<8x128xf32>
    %35 = arith.subf %23, %34 : vector<8x128xf32>
    %c0_21 = arith.constant 0 : index
    %c0_22 = arith.constant 0 : index
    %36 = vector.load %arg11[%c0_21, %c0_22] : memref<8x128xf32, #tpu.memory_space<vmem>>, vector<8x128xf32>
    tpu.vector_store %arg11[%c0_21, %c0_22], %35 {strides = array<i32>} : memref<8x128xf32, #tpu.memory_space<vmem>>, vector<8x128xf32>,
    %c0_23 = arith.constant 0 : index
    %c0_24 = arith.constant 0 : index
    %37 = vector.load %arg8[%c0_23, %c0_24] : memref<1x256xf32, #tpu.memory_space<vmem>>, vector<1x256xf32>
    %38 = vector.broadcast %37 : vector<1x256xf32> to vector<8x256xf32>
    %39 = arith.mulf %9, %38 : vector<8x256xf32>
    %cst_25 = arith.constant dense<0.000000e+00> : vector<8xf32>
    %40 = vector.multi_reduction <add>, %39, %cst_25 [1] : vector<8x256xf32> to vector<8xf32>
    %41 = vector.shape_cast %40 : vector<8xf32> to vector<8x1xf32>
    %c0_26 = arith.constant 0 : index
    %c0_27 = arith.constant 0 : index
    %42 = vector.load %arg9[%c0_26, %c0_27] : memref<1x1xf32, #tpu.memory_space<vmem>>, vector<1x1xf32>
    %43 = vector.broadcast %42 : vector<1x1xf32> to vector<8x1xf32>
    %44 = arith.addf %41, %43 : vector<8x1xf32>
    %45 = vector.shape_cast %44 : vector<8x1xf32> to vector<8x1xf32>
    %46 = vector.broadcast %45 : vector<8x1xf32> to vector<8x128xf32>
    %c0_28 = arith.constant 0 : index
    %c0_29 = arith.constant 0 : index
    %47 = vector.load %arg12[%c0_28, %c0_29] : memref<8x128xf32, #tpu.memory_space<vmem>>, vector<8x128xf32>
    tpu.vector_store %arg12[%c0_28, %c0_29], %46 {strides = array<i32>} : memref<8x128xf32, #tpu.memory_space<vmem>>, vector<8x128xf32>,
    return
  }
  func.func @transform_0(%arg0: i32) -> (i32, i32) {
    %c0_i32 = arith.constant 0 : i32
    %c0_i32_0 = arith.constant 0 : i32
    return %arg0, %c0_i32 : i32, i32
  }
  func.func @transform_1(%arg0: i32) -> (i32, i32) {
    %c0_i32 = arith.constant 0 : i32
    %c0_i32_0 = arith.constant 0 : i32
    %c0_i32_1 = arith.constant 0 : i32
    return %c0_i32, %c0_i32_0 : i32, i32
  }
  func.func @transform_2(%arg0: i32) -> (i32, i32) {
    %c0_i32 = arith.constant 0 : i32
    %c0_i32_0 = arith.constant 0 : i32
    %c0_i32_1 = arith.constant 0 : i32
    return %c0_i32, %c0_i32_0 : i32, i32
  }
  func.func @transform_3(%arg0: i32) -> (i32, i32) {
    %c0_i32 = arith.constant 0 : i32
    %c0_i32_0 = arith.constant 0 : i32
    %c0_i32_1 = arith.constant 0 : i32
    return %c0_i32, %c0_i32_0 : i32, i32
  }
  func.func @transform_4(%arg0: i32) -> (i32, i32) {
    %c0_i32 = arith.constant 0 : i32
    %c0_i32_0 = arith.constant 0 : i32
    %c0_i32_1 = arith.constant 0 : i32
    return %c0_i32, %c0_i32_0 : i32, i32
  }
  func.func @transform_5(%arg0: i32) -> (i32, i32) {
    %c0_i32 = arith.constant 0 : i32
    %c0_i32_0 = arith.constant 0 : i32
    %c0_i32_1 = arith.constant 0 : i32
    return %c0_i32, %c0_i32_0 : i32, i32
  }
  func.func @transform_6(%arg0: i32) -> (i32, i32) {
    %c0_i32 = arith.constant 0 : i32
    %c0_i32_0 = arith.constant 0 : i32
    %c0_i32_1 = arith.constant 0 : i32
    return %c0_i32, %c0_i32_0 : i32, i32
  }
  func.func @transform_7(%arg0: i32) -> (i32, i32) {
    %c0_i32 = arith.constant 0 : i32
    %c0_i32_0 = arith.constant 0 : i32
    %c0_i32_1 = arith.constant 0 : i32
    return %c0_i32, %c0_i32_0 : i32, i32
  }
  func.func @transform_8(%arg0: i32) -> (i32, i32) {
    %c0_i32 = arith.constant 0 : i32
    %c0_i32_0 = arith.constant 0 : i32
    %c0_i32_1 = arith.constant 0 : i32
    return %c0_i32, %c0_i32_0 : i32, i32
  }
  func.func @transform_9(%arg0: i32) -> (i32, i32) {
    %c0_i32 = arith.constant 0 : i32
    %c0_i32_0 = arith.constant 0 : i32
    return %arg0, %c0_i32 : i32, i32
  }
  func.func @transform_10(%arg0: i32) -> (i32, i32) {
    %c0_i32 = arith.constant 0 : i32
    %c0_i32_0 = arith.constant 0 : i32
    return %arg0, %c0_i32 : i32, i32
  }
  func.func @transform_11(%arg0: i32) -> (i32, i32) {
    %c0_i32 = arith.constant 0 : i32
    %c0_i32_0 = arith.constant 0 : i32
    return %arg0, %c0_i32 : i32, i32
  }
}

</mosaic_0001>

<bundles_post_ra>
// kernel: tpu_custom_call.1
= control target key start
LH: loop header
LB: loop body
LE: loop exit
PB: predicated region body
PF: predicated region fallthrough
CT: control target
= control target key end

     0   :  { %s1598_s0 = inlined_call_operand.hbm [shape: bf16[8,256], index: 0, kind: input, shape index: {}]   ;;  %s1599_s1 = inlined_call_operand.hbm [shape: bf16[256,512], index: 1, kind: input, shape index: {}]   ;;  %s1600_s2 = inlined_call_operand.vmem [shape: f32[1,512], index: 2, kind: input, shape index: {}]   ;;  %s1601_s3 = inlined_call_operand.hbm [shape: bf16[256,128], index: 3, kind: input, shape index: {}]   ;;  %s1602_s4 = inlined_call_operand.vmem [shape: f32[1,128], index: 4, kind: input, shape index: {}]   ;;  %s1603_s5 = inlined_call_operand.hbm [shape: bf16[128,128], index: 5, kind: input, shape index: {}]   ;;  %s1604_s6 = inlined_call_operand.vmem [shape: f32[1,128], index: 6, kind: input, shape index: {}]   ;;  %s1605_s7 = inlined_call_operand.vmem [shape: f32[1,256], index: 7, kind: input, shape index: {}]   ;;  %s1606_s8 = inlined_call_operand.<no memory space> [shape: f32[1,1], index: 8, kind: input, shape index: {}]   ;;  %s1607_s9 = inlined_call_operand.hbm [shape: f32[8,128], index: 9, kind: output, shape index: {0}]   ;;  %s1608_s10 = inlined_call_operand.hbm [shape: f32[8,128], index: 10, kind: output, shape index: {1}]   ;;  %s1609_s11 = inlined_call_operand.hbm [shape: f32[8,128], index: 11, kind: output, shape index: {2}]  }
   0x1   :  { %v17_v0 = vstv %s1606_s8 }
   0x2   :  { %18 = vst [vmem:[#allocation2] sm:$0x1] %v17_v0 }
   0x3   :  { %19 = vsyncpa [#allocation4], 0 }
   0x4   :  { %20 = vsyncpa [#allocation7], 0 }
   0x5   :  { %21 = vsyncpa [#allocation10], 0 }
   0x6   :  { %22 = vsyncpa [#allocation5], 0 }
   0x7   :  { %23 = vsyncpa [#allocation13], 0  ;;  %s1421_s19 = smov [#allocation6]   ;;  %s1257_s23 = scalar_lea.hbm %s1599_s1, 8192 }
   0x8   :  { %s39_s20 = sshll.u32 %s1421_s19, 4  ;;  %p1258_p0 = scmp.ne.s32.totalorder %s1599_s1, %s1257_s23  ;;  %s40_s20 = int_to_ptr.vmem [resolvable:$true] %s39_s20 }
   0x9   :  { %p1261_p1 = scmp.lt.u32.totalorder %s1257_s23, %s1599_s1 }
   0xb   :  { %p1263_p2 = pnand %p1261_p1, %p1258_p0 }
   0xd   :  { %1266 = shalt.err (!%p1263_p2)
}
   0xe   :  { %s1267_s8 = scalar_lea.vmem %s40_s20, 8192  ;;  %p1272_p4 = scmp.lt.s32.totalorder %s40_s20, %s40_s20 }
   0xf   :  { %p1268_p3 = scmp.ne.s32.totalorder %s40_s20, %s1267_s8  ;;  %p1273_p5 = scmp.lt.s32.totalorder %s1267_s8, %s1267_s8 }
  0x11   :  { %p1274_p6 = por %p1273_p5, %p1272_p4 }
  0x13   :  { %p1275_p7 = pnand %p1274_p6, %p1268_p3 }
  0x15   :  { %1278 = shalt.err (!%p1275_p7)
}
  0x16   :  { %s1422_s28 = smov 256   ;;  %s1423_s29 = smov 16  }
  0x17   :  { %45 = dma.hbm_to_vmem [thread:$0]  %s1599_s1, 8192, %s40_s20, [#allocation7], %s1422_s28, %s1422_s28, %s1423_s29  }
  0x18   :  { %s1424_s13 = smov [#allocation3]   ;;  %s1425_s15 = smov [#allocation8]  }
  0x19   :  { %s30_s14 = sshll.u32 %s1424_s13, 4  ;;  %s53_s16 = sshll.u32 %s1425_s15, 4  ;;  %s31_s14 = int_to_ptr.vmem [resolvable:$true] %s30_s14  ;;  %s54_s16 = int_to_ptr.vmem [resolvable:$true] %s53_s16 }
  0x1a   :  { %s1279_s19 = scalar_lea.hbm %s1598_s0, 128 }
  0x1b   :  { %p1280_p8 = scmp.ne.s32.totalorder %s1598_s0, %s1279_s19  ;;  %p1283_p9 = scmp.lt.u32.totalorder %s1279_s19, %s1598_s0 }
  0x1d   :  { %p1285_p10 = pnand %p1283_p9, %p1280_p8 }
  0x1f   :  { %1288 = shalt.err (!%p1285_p10)
}
  0x20   :  { %s1289_s1 = scalar_lea.vmem %s31_s14, 128  ;;  %p1294_p12 = scmp.lt.s32.totalorder %s31_s14, %s31_s14 }
  0x21   :  { %p1290_p11 = scmp.ne.s32.totalorder %s31_s14, %s1289_s1  ;;  %p1295_p13 = scmp.lt.s32.totalorder %s1289_s1, %s1289_s1 }
  0x23   :  { %p1296_p0 = por %p1295_p13, %p1294_p12 }
  0x25   :  { %p1297_p1 = pnand %p1296_p0, %p1290_p11 }
  0x27   :  { %1300 = shalt.err (!%p1297_p1)
}
  0x28   :  { %33 = dma.hbm_to_vmem [thread:$0]  %s1598_s0, 128, %s31_s14, [#allocation4]  }
  0x29   :  { %s1301_s8 = scalar_lea.hbm %s1601_s3, 2048 }
  0x2a   :  { %p1302_p2 = scmp.ne.s32.totalorder %s1601_s3, %s1301_s8  ;;  %p1305_p3 = scmp.lt.u32.totalorder %s1301_s8, %s1601_s3 }
  0x2c   :  { %p1307_p4 = pnand %p1305_p3, %p1302_p2 }
  0x2e   :  { %1310 = shalt.err (!%p1307_p4)
}
  0x2f   :  { %s1311_s13 = scalar_lea.vmem %s54_s16, 2048  ;;  %p1316_p6 = scmp.lt.s32.totalorder %s54_s16, %s54_s16 }
  0x30   :  { %p1312_p5 = scmp.ne.s32.totalorder %s54_s16, %s1311_s13  ;;  %p1317_p7 = scmp.lt.s32.totalorder %s1311_s13, %s1311_s13 }
  0x32   :  { %p1318_p8 = por %p1317_p7, %p1316_p6 }
  0x34   :  { %p1319_p9 = pnand %p1318_p8, %p1312_p5 }
  0x36   :  { %1322 = shalt.err (!%p1319_p9)
}
  0x37   :  { %s1426_s0 = smov 64   ;;  %s1427_s14 = smov 4  }
  0x38   :  { %59 = dma.hbm_to_vmem [thread:$0]  %s1601_s3, 2048, %s54_s16, [#allocation7], %s1426_s0, %s1426_s0, %s1427_s14  }
  0x39   :  { %s1428_s18 = smov [#allocation9]   ;;  %s1323_s23 = scalar_lea.hbm %s1603_s5, 1024 }
  0x3a   :  { %s67_s19 = sshll.u32 %s1428_s18, 4  ;;  %p1324_p10 = scmp.ne.s32.totalorder %s1603_s5, %s1323_s23  ;;  %s68_s19 = int_to_ptr.vmem [resolvable:$true] %s67_s19 }
  0x3b   :  { %p1327_p11 = scmp.lt.u32.totalorder %s1323_s23, %s1603_s5 }
  0x3d   :  { %p1329_p12 = pnand %p1327_p11, %p1324_p10 }
  0x3f   :  { %1332 = shalt.err (!%p1329_p12)
}
  0x40   :  { %s1333_s26 = scalar_lea.vmem %s68_s19, 1024  ;;  %p1338_p0 = scmp.lt.s32.totalorder %s68_s19, %s68_s19 }
  0x41   :  { %p1334_p13 = scmp.ne.s32.totalorder %s68_s19, %s1333_s26  ;;  %p1339_p1 = scmp.lt.s32.totalorder %s1333_s26, %s1333_s26 }
  0x43   :  { %p1340_p2 = por %p1339_p1, %p1338_p0 }
  0x45   :  { %p1341_p3 = pnand %p1340_p2, %p1334_p13 }
  0x47   :  { %1344 = shalt.err (!%p1341_p3)
}
  0x48   :  { %73 = dma.hbm_to_vmem [thread:$0]  %s1603_s5, 1024, %s68_s19, [#allocation10], %s1426_s0, %s1426_s0, %s1427_s14  }
  0x49   :  { %1411 = dma.done.wait [#allocation4], 128  }
  0x4a   :  { %1412 = vsyncadd [#allocation4], 4294967168 }
  0x4b   :  { %1413 = dma.done.wait [#allocation7], 10240  }
  0x4c   :  { %1414 = vsyncadd [#allocation7], 4294957056 }
  0x4d   :  { %1415 = dma.done.wait [#allocation10], 1024  }
  0x4e   :  { %1416 = vsyncadd [#allocation10], 4294966272  ;;  %v1131_v1 = vld [vmem:[#allocation6 + $0x4] ss:$16 sps:$4 sm:$0xff]   ;;  %v1133_v2 = vld [vmem:[#allocation6] ss:$16 sps:$4 sm:$0xff]  }
  0x4f   :  { %507 = vmatprep.subr.bf16.mxu0 %v1131_v1  ;;  %v1134_v3 = vld [vmem:[#allocation6 + $0x24] ss:$16 sps:$4 sm:$0xff]   ;;  %v1136_v4 = vld [vmem:[#allocation6 + $0x20] ss:$16 sps:$4 sm:$0xff]   ;;  %v93_v14 = vld [vmem:[#allocation3] sm:$0xff]  ;;  %vm1430_vm0 = vmmov 0  }
  0x50   :  { %508 = vmatpush1.bf16.msra.mxu0 %v1133_v2  ;;  %v1137_v5 = vld [vmem:[#allocation6 + $0x44] ss:$16 sps:$4 sm:$0xff]   ;;  %v1139_v6 = vld [vmem:[#allocation6 + $0x40] ss:$16 sps:$4 sm:$0xff]   ;;  %v972_v15 = vcombine.high %v93_v14, %v93_v14  ;;  %v1546_v36 = vcombine.low %v93_v14, %v93_v14  ;;  %v1183_v38 = vld [vmem:[#allocation8 + $0x48] sm:$0xff]  }
  0x51   :  { %509 = vmatprep.subr.bf16.mxu0 %v1134_v3  ;;  %v1140_v7 = vld [vmem:[#allocation6 + $0x64] ss:$16 sps:$4 sm:$0xff]   ;;  %v1142_v8 = vld [vmem:[#allocation6 + $0x60] ss:$16 sps:$4 sm:$0xff]   ;;  %v1184_v39 = vld [vmem:[#allocation8 + $0x8] sm:$0xff]  }
  0x52   :  { %v1143_v9 = vld [vmem:[#allocation6 + $0x84] ss:$16 sps:$4 sm:$0xff]   ;;  %v1145_v10 = vld [vmem:[#allocation6 + $0x80] ss:$16 sps:$4 sm:$0xff]   ;;  %539 = vmatprep.mubr.bf16.mxu0 %v972_v15  ;;  %580 = vmatprep.mubr.bf16.mxu1 %v972_v15  ;;  %v1187_v42 = vld [vmem:[#allocation8 + $0x58] sm:$0xff]  }
  0x53   :  { %v1146_v11 = vld [vmem:[#allocation6 + $0xa4] ss:$16 sps:$4 sm:$0xff]   ;;  %v1148_v12 = vld [vmem:[#allocation6 + $0xa0] ss:$16 sps:$4 sm:$0xff]   ;;  %v1188_v43 = vld [vmem:[#allocation8 + $0x18] sm:$0xff]  }
  0x54   :  { %510 = vmatpush1.bf16.msra.mxu0 %v1136_v4  ;;  %v1149_v13 = vld [vmem:[#allocation6 + $0xc4] ss:$16 sps:$4 sm:$0xff]   ;;  %v1151_v16 = vld [vmem:[#allocation6 + $0xc0] ss:$16 sps:$4 sm:$0xff]   ;;  %v1191_v46 = vld [vmem:[#allocation8 + $0x68] sm:$0xff]  }
  0x55   :  { %511 = vmatprep.subr.bf16.mxu0 %v1137_v5  ;;  %v1152_v17 = vld [vmem:[#allocation6 + $0xe4] ss:$16 sps:$4 sm:$0xff]   ;;  %v1154_v18 = vld [vmem:[#allocation6 + $0xe0] ss:$16 sps:$4 sm:$0xff]   ;;  %v1192_v47 = vld [vmem:[#allocation8 + $0x28] sm:$0xff]  }
  0x56   :  { %v1155_v19 = vld [vmem:[#allocation6 + $0x104] ss:$16 sps:$4 sm:$0xff]   ;;  %v1157_v20 = vld [vmem:[#allocation6 + $0x100] ss:$16 sps:$4 sm:$0xff]   ;;  %v1195_v50 = vld [vmem:[#allocation8 + $0x78] sm:$0xff]  }
  0x57   :  { %v1158_v21 = vld [vmem:[#allocation6 + $0x124] ss:$16 sps:$4 sm:$0xff]   ;;  %v1160_v22 = vld [vmem:[#allocation6 + $0x120] ss:$16 sps:$4 sm:$0xff]   ;;  %v1196_v51 = vld [vmem:[#allocation8 + $0x38] sm:$0xff]  }
  0x58   :  { %512 = vmatpush1.bf16.msra.mxu0 %v1139_v6  ;;  %v1161_v23 = vld [vmem:[#allocation6 + $0x144] ss:$16 sps:$4 sm:$0xff]   ;;  %v1163_v24 = vld [vmem:[#allocation6 + $0x140] ss:$16 sps:$4 sm:$0xff]   ;;  %v1197_v52 = vld [vmem:[#allocation6 + $0xc] ss:$16 sps:$4 sm:$0xff]  }
  0x59   :  { %513 = vmatprep.subr.bf16.mxu0 %v1140_v7  ;;  %v1164_v25 = vld [vmem:[#allocation6 + $0x164] ss:$16 sps:$4 sm:$0xff]   ;;  %v1166_v26 = vld [vmem:[#allocation6 + $0x160] ss:$16 sps:$4 sm:$0xff]   ;;  %v1199_v53 = vld [vmem:[#allocation6 + $0x8] ss:$16 sps:$4 sm:$0xff]   ;;  %548 = vmatprep.subr.bf16.mxu1 %v1197_v52 }
  0x5a   :  { %v1167_v27 = vld [vmem:[#allocation6 + $0x184] ss:$16 sps:$4 sm:$0xff]   ;;  %v1169_v28 = vld [vmem:[#allocation6 + $0x180] ss:$16 sps:$4 sm:$0xff]   ;;  %v1200_v54 = vld [vmem:[#allocation6 + $0x2c] ss:$16 sps:$4 sm:$0xff]   ;;  %549 = vmatpush1.bf16.msra.mxu1 %v1199_v53 }
  0x5b   :  { %v1170_v29 = vld [vmem:[#allocation6 + $0x1a4] ss:$16 sps:$4 sm:$0xff]   ;;  %v1172_v30 = vld [vmem:[#allocation6 + $0x1a0] ss:$16 sps:$4 sm:$0xff]   ;;  %v1202_v55 = vld [vmem:[#allocation6 + $0x28] ss:$16 sps:$4 sm:$0xff]   ;;  %550 = vmatprep.subr.bf16.mxu1 %v1200_v54 }
  0x5c   :  { %514 = vmatpush1.bf16.msra.mxu0 %v1142_v8  ;;  %v1173_v31 = vld [vmem:[#allocation6 + $0x1c4] ss:$16 sps:$4 sm:$0xff]   ;;  %v1175_v32 = vld [vmem:[#allocation6 + $0x1c0] ss:$16 sps:$4 sm:$0xff]   ;;  %v1203_v56 = vld [vmem:[#allocation6 + $0x4c] ss:$16 sps:$4 sm:$0xff]  }
  0x5d   :  { %515 = vmatprep.subr.bf16.mxu0 %v1143_v9  ;;  %v1176_v33 = vld [vmem:[#allocation6 + $0x1e4] ss:$16 sps:$4 sm:$0xff]   ;;  %v1178_v34 = vld [vmem:[#allocation6 + $0x1e0] ss:$16 sps:$4 sm:$0xff]   ;;  %v1205_v57 = vld [vmem:[#allocation6 + $0x48] ss:$16 sps:$4 sm:$0xff]  }
  0x5e   :  { %v1181_v35 = vld [vmem:[#allocation8 + $0x40] sm:$0xff]   ;;  %v1185_v40 = vld [vmem:[#allocation8 + $0x50] sm:$0xff]   ;;  %551 = vmatpush1.bf16.msra.mxu1 %v1202_v55  ;;  %v1206_v58 = vld [vmem:[#allocation6 + $0x6c] ss:$16 sps:$4 sm:$0xff]  }
  0x5f   :  { %v1182_v37 = vld [vmem:[#allocation8] sm:$0xff]   ;;  %v1186_v41 = vld [vmem:[#allocation8 + $0x10] sm:$0xff]   ;;  %552 = vmatprep.subr.bf16.mxu1 %v1203_v56  ;;  %v1208_v59 = vld [vmem:[#allocation6 + $0x68] ss:$16 sps:$4 sm:$0xff]  }
  0x60   :  { %516 = vmatpush1.bf16.msra.mxu0 %v1145_v10  ;;  %v1189_v44 = vld [vmem:[#allocation8 + $0x60] sm:$0xff]   ;;  %v1193_v48 = vld [vmem:[#allocation8 + $0x70] sm:$0xff]   ;;  %v1209_v60 = vld [vmem:[#allocation6 + $0x8c] ss:$16 sps:$4 sm:$0xff]  }
  0x61   :  { %517 = vmatprep.subr.bf16.mxu0 %v1146_v11  ;;  %v1190_v45 = vld [vmem:[#allocation8 + $0x20] sm:$0xff]   ;;  %v1194_v49 = vld [vmem:[#allocation8 + $0x30] sm:$0xff]   ;;  %v1211_v61 = vld [vmem:[#allocation6 + $0x88] ss:$16 sps:$4 sm:$0xff]  }
  0x62   :  { %553 = vmatpush1.bf16.msra.mxu1 %v1205_v57  ;;  %v1212_v62 = vld [vmem:[#allocation6 + $0xac] ss:$16 sps:$4 sm:$0xff]   ;;  %v1214_v63 = vld [vmem:[#allocation6 + $0xa8] ss:$16 sps:$4 sm:$0xff]  }
  0x63   :  { %554 = vmatprep.subr.bf16.mxu1 %v1206_v58  ;;  %v1215_v0 = vld [vmem:[#allocation6 + $0xcc] ss:$16 sps:$4 sm:$0xff]   ;;  %v1217_v1 = vld [vmem:[#allocation6 + $0xc8] ss:$16 sps:$4 sm:$0xff]  }
  0x64   :  { %518 = vmatpush1.bf16.msra.mxu0 %v1148_v12  ;;  %v1218_v2 = vld [vmem:[#allocation6 + $0xec] ss:$16 sps:$4 sm:$0xff]   ;;  %v1220_v3 = vld [vmem:[#allocation6 + $0xe8] ss:$16 sps:$4 sm:$0xff]  }
  0x65   :  { %519 = vmatprep.subr.bf16.mxu0 %v1149_v13  ;;  %v1221_v4 = vld [vmem:[#allocation6 + $0x10c] ss:$16 sps:$4 sm:$0xff]   ;;  %v1223_v5 = vld [vmem:[#allocation6 + $0x108] ss:$16 sps:$4 sm:$0xff]  }
  0x66   :  { %555 = vmatpush1.bf16.msra.mxu1 %v1208_v59  ;;  %v1224_v6 = vld [vmem:[#allocation6 + $0x12c] ss:$16 sps:$4 sm:$0xff]   ;;  %v1226_v7 = vld [vmem:[#allocation6 + $0x128] ss:$16 sps:$4 sm:$0xff]  }
  0x67   :  { %556 = vmatprep.subr.bf16.mxu1 %v1209_v60  ;;  %v1227_v8 = vld [vmem:[#allocation6 + $0x14c] ss:$16 sps:$4 sm:$0xff]   ;;  %v1229_v9 = vld [vmem:[#allocation6 + $0x148] ss:$16 sps:$4 sm:$0xff]  }
  0x68   :  { %520 = vmatpush1.bf16.msra.mxu0 %v1151_v16  ;;  %v1230_v10 = vld [vmem:[#allocation6 + $0x16c] ss:$16 sps:$4 sm:$0xff]   ;;  %v1232_v11 = vld [vmem:[#allocation6 + $0x168] ss:$16 sps:$4 sm:$0xff]  }
  0x69   :  { %521 = vmatprep.subr.bf16.mxu0 %v1152_v17  ;;  %v1233_v12 = vld [vmem:[#allocation6 + $0x18c] ss:$16 sps:$4 sm:$0xff]   ;;  %v1235_v13 = vld [vmem:[#allocation6 + $0x188] ss:$16 sps:$4 sm:$0xff]  }
  0x6a   :  { %557 = vmatpush1.bf16.msra.mxu1 %v1211_v61  ;;  %v1236_v14 = vld [vmem:[#allocation6 + $0x1ac] ss:$16 sps:$4 sm:$0xff]   ;;  %v1238_v15 = vld [vmem:[#allocation6 + $0x1a8] ss:$16 sps:$4 sm:$0xff]  }
  0x6b   :  { %558 = vmatprep.subr.bf16.mxu1 %v1212_v62  ;;  %v1239_v16 = vld [vmem:[#allocation6 + $0x1cc] ss:$16 sps:$4 sm:$0xff]   ;;  %v1241_v17 = vld [vmem:[#allocation6 + $0x1c8] ss:$16 sps:$4 sm:$0xff]  }
  0x6c   :  { %522 = vmatpush1.bf16.msra.mxu0 %v1154_v18  ;;  %v1242_v18 = vld [vmem:[#allocation6 + $0x1ec] ss:$16 sps:$4 sm:$0xff]  }
  0x6d   :  { %523 = vmatprep.subr.bf16.mxu0 %v1155_v19  ;;  %v1244_v19 = vld [vmem:[#allocation6 + $0x1e8] ss:$16 sps:$4 sm:$0xff]  }
  0x6e   :  { %559 = vmatpush1.bf16.msra.mxu1 %v1214_v63 }
  0x6f   :  { %560 = vmatprep.subr.bf16.mxu1 %v1215_v0 }
  0x70   :  { %524 = vmatpush1.bf16.msra.mxu0 %v1157_v20  ;;  %v1245_v20 = vld [vmem:[#allocation9] sm:$0xff]  }
  0x71   :  { %525 = vmatprep.subr.bf16.mxu0 %v1158_v21  ;;  %v1429_v21 = vmov 0.0  }
  0x72   :  { %561 = vmatpush1.bf16.msra.mxu1 %v1217_v1  ;;  %v896_v1 = vld [vmem:[%s1605_s7] sm:$0x3] }
  0x73   :  { %562 = vmatprep.subr.bf16.mxu1 %v1218_v2 }
  0x74   :  { %526 = vmatpush1.bf16.msra.mxu0 %v1160_v22  ;;  %v1246_v22 = vld [vmem:[#allocation9 + $0x8] sm:$0xff]  }
  0x75   :  { %527 = vmatprep.subr.bf16.mxu0 %v1161_v23  ;;  %v1247_v23 = vld [vmem:[#allocation9 + $0x10] sm:$0xff]  }
  0x76   :  { %563 = vmatpush1.bf16.msra.mxu1 %v1220_v3 }
  0x77   :  { %564 = vmatprep.subr.bf16.mxu1 %v1221_v4 }
  0x78   :  { %528 = vmatpush1.bf16.msra.mxu0 %v1163_v24  ;;  %v1248_v24 = vld [vmem:[#allocation9 + $0x18] sm:$0xff]  }
  0x79   :  { %529 = vmatprep.subr.bf16.mxu0 %v1164_v25  ;;  %v1249_v25 = vld [vmem:[#allocation9 + $0x20] sm:$0xff]  }
  0x7a   :  { %565 = vmatpush1.bf16.msra.mxu1 %v1223_v5 }
  0x7b   :  { %566 = vmatprep.subr.bf16.mxu1 %v1224_v6 }
  0x7c   :  { %530 = vmatpush1.bf16.msra.mxu0 %v1166_v26  ;;  %v1250_v26 = vld [vmem:[#allocation9 + $0x28] sm:$0xff]  }
  0x7d   :  { %531 = vmatprep.subr.bf16.mxu0 %v1167_v27  ;;  %v160_v27 = vlaneseq }
  0x7e   :  { %567 = vmatpush1.bf16.msra.mxu1 %v1226_v7 }
  0x7f   :  { %568 = vmatprep.subr.bf16.mxu1 %v1227_v8 }
  0x80   :  { %532 = vmatpush1.bf16.msra.mxu0 %v1169_v28  ;;  %v161_v28 = vshrl.u32 %v160_v27, 7 }
  0x81   :  { %533 = vmatprep.subr.bf16.mxu0 %v1170_v29 }
  0x82   :  { %569 = vmatpush1.bf16.msra.mxu1 %v1229_v9  ;;  %v162_v29 = vsub.s32 0, %v161_v28  ;;  %v170_v59 = vsub.s32 2, %v161_v28  ;;  %v174_v60 = vsub.s32 3, %v161_v28  ;;  %v1054_v9 = vld [vmem:[%s1604_s6] ss:$0 sm:$0xff]  ;;  %s1432_s6 = smov [#allocation11]  }
  0x83   :  { %570 = vmatprep.subr.bf16.mxu1 %v1230_v10  ;;  %s933_s7 = sshll.u32 %s1432_s6, 4  ;;  %s934_s7 = int_to_ptr.vmem [resolvable:$true] %s933_s7 }
  0x84   :  { %534 = vmatpush1.bf16.msra.mxu0 %v1172_v30  ;;  %v158_v30 = vld [vmem:[%s1600_s2] sm:$0xf]  ;;  %v901_v3 = vrot.slane %v896_v1, %v162_v29  ;;  %s1345_s12 = scalar_lea.vmem %s934_s7, 128  ;;  %p1350_p5 = scmp.lt.s32.totalorder %s934_s7, %s934_s7 }
  0x85   :  { %535 = vmatprep.subr.bf16.mxu0 %v1173_v31  ;;  %v166_v31 = vsub.s32 1, %v161_v28  ;;  %v171_v61 = vrot.slane %v158_v30, %v170_v59  ;;  %v175_v62 = vrot.slane %v158_v30, %v174_v60  ;;  %p1346_p4 = scmp.ne.s32.totalorder %s934_s7, %s1345_s12  ;;  %p1351_p6 = scmp.lt.s32.totalorder %s1345_s12, %s1345_s12 }
  0x86   :  { %571 = vmatpush1.bf16.msra.mxu1 %v1232_v11 }
  0x87   :  { %572 = vmatprep.subr.bf16.mxu1 %v1233_v12  ;;  %v905_v5 = vrot.slane %v896_v1, %v166_v31  ;;  %p1352_p7 = por %p1351_p6, %p1350_p5 }
  0x88   :  { %536 = vmatpush1.bf16.msra.mxu0 %v1175_v32  ;;  %v163_v32 = vrot.slane %v158_v30, %v162_v29 }
  0x89   :  { %537 = vmatprep.subr.bf16.mxu0 %v1176_v33  ;;  %v167_v33 = vrot.slane %v158_v30, %v166_v31  ;;  %p1353_p8 = pnand %p1352_p7, %p1346_p4 }
  0x8a   :  { %573 = vmatpush1.bf16.msra.mxu1 %v1235_v13 }
  0x8b   :  { %574 = vmatprep.subr.bf16.mxu1 %v1236_v14 }
  0x8c   :  { %538 = vmatpush1.bf16.msra.mxu0 %v1178_v34 }
  0x8d   :  { %1064 = vmatprep.subr.bf16.mxu0 %v1181_v35 }
  0x8e   :  { %575 = vmatpush1.bf16.msra.mxu1 %v1238_v15  ;;  %v1431_v15 = vmov 0  }
  0x8f   :  { %540 = vmatmul.mubr.bf16.vlgmr.msra.gmra.mrb[0].mxu0 %v1546_v36  ;;  %576 = vmatprep.subr.bf16.mxu1 %v1239_v16 }
  0x90   :  { %1065 = vmatpush3.bf16.msra.mxu0 %v1182_v37  ;;  %1129 = vset.pattern.permute.xlu1 %v1431_v15 }
  0x91   :  { %1066 = vmatprep.subr.bf16.mxu0 %v1183_v38  ;;  %1130 = vset.pattern.permute.xlu0 %v1431_v15 }
  0x92   :  { %577 = vmatpush1.bf16.msra.mxu1 %v1241_v17 }
  0x93   :  { %578 = vmatprep.subr.bf16.mxu1 %v1242_v18 }
  0x94   :  { %1067 = vmatpush3.bf16.msra.mxu0 %v1184_v39 }
  0x95   :  { %1068 = vmatprep.subr.bf16.mxu0 %v1185_v40 }
  0x96   :  { %579 = vmatpush1.bf16.msra.mxu1 %v1244_v19 }
  0x97   :  { %1095 = vmatprep.subr.bf16.mxu1 %v1429_v21 }
  0x98   :  { %1069 = vmatpush3.bf16.msra.mxu0 %v1186_v41 }
  0x99   :  { %1070 = vmatprep.subr.bf16.mxu0 %v1187_v42  ;;  %581 = vmatmul.mubr.bf16.vlgmr.msra.gmra.mrb[0].mxu1 %v1546_v36 }
  0x9a   :  { %1096 = vmatpush3.bf16.msra.mxu1 %v1245_v20  ;;  %1111 = vmatprep.mubr.msk.bf16.mxu1 %vm1430_vm0, %v1429_v21  ;;  %v1063_v20 = vld [vmem:[#allocation2] ss:$0 sm:$0xff] }
  0x9b   :  { %1097 = vmatprep.subr.bf16.mxu1 %v1429_v21 }
  0x9c   :  { %1071 = vmatpush3.bf16.msra.mxu0 %v1188_v43 }
  0x9d   :  { %1072 = vmatprep.subr.bf16.mxu0 %v1189_v44  ;;  %v1251_v44 = vld [vmem:[#allocation9 + $0x30] sm:$0xff]  }
  0x9e   :  { %1098 = vmatpush3.bf16.msra.mxu1 %v1246_v22 }
  0x9f   :  { %1099 = vmatprep.subr.bf16.mxu1 %v1429_v21 }
  0xa0   :  { %1073 = vmatpush3.bf16.msra.mxu0 %v1190_v45  ;;  %v1252_v45 = vld [vmem:[#allocation9 + $0x38] sm:$0xff]  }
  0xa1   :  { %1074 = vmatprep.subr.bf16.mxu0 %v1191_v46 }
  0xa2   :  { %1100 = vmatpush3.bf16.msra.mxu1 %v1247_v23 }
  0xa3   :  { %1101 = vmatprep.subr.bf16.mxu1 %v1429_v21 }
  0xa4   :  { %1075 = vmatpush3.bf16.msra.mxu0 %v1192_v47 }
  0xa5   :  { %1076 = vmatprep.subr.bf16.mxu0 %v1193_v48 }
  0xa6   :  { %1102 = vmatpush3.bf16.msra.mxu1 %v1248_v24 }
  0xa7   :  { %1103 = vmatprep.subr.bf16.mxu1 %v1429_v21 }
  0xa8   :  { %1077 = vmatpush3.bf16.msra.mxu0 %v1194_v49 }
  0xa9   :  { %1078 = vmatprep.subr.bf16.mxu0 %v1195_v50 }
  0xaa   :  { %1104 = vmatpush3.bf16.msra.mxu1 %v1249_v25 }
  0xab   :  { %1105 = vmatprep.subr.bf16.mxu1 %v1429_v21 }
  0xac   :  { %1079 = vmatpush3.bf16.msra.mxu0 %v1196_v51  ;;  %v1037_v51 = vld [vmem:[%s1602_s4] ss:$0 sm:$0xff] }
  0xae   :  { %1106 = vmatpush3.bf16.msra.mxu1 %v1250_v26 }
  0xaf   :  { %1107 = vmatprep.subr.bf16.mxu1 %v1429_v21 }
  0xb2   :  { %1108 = vmatpush3.bf16.msra.mxu1 %v1251_v44 }
  0xb3   :  { %1109 = vmatprep.subr.bf16.mxu1 %v1429_v21 }
  0xb6   :  { %1110 = vmatpush3.bf16.msra.mxu1 %v1252_v45 }
 0x162   :  { %v541_v34 = vpop.f32.mrb[0].mxu0 }
 0x163   :  { %v542_v35 = vadd.f32 %v541_v34, %v163_v32  ;;  %v543_v36 = vpop.f32.mrb[1].mxu0 }
 0x164   :  { %v544_v37 = vadd.f32 %v543_v36, %v167_v33  ;;  %v545_v38 = vpop.f32.mrb[2].mxu0 }
 0x165   :  { %v589_v39 = vmax.f32 %v542_v35, 0.0  ;;  %v546_v40 = vpop.f32.mrb[3].mxu0 }
 0x166   :  { %v590_v41 = vmax.f32 %v544_v37, 0.0 }
 0x167   :  { %v593_v43 = vpack.c.bf16 %v589_v39, %v589_v39 }
 0x168   :  { %v594_v42 = vpack.c.bf16 %v590_v41, %v590_v41 }
 0x16a   :  { %762 = vmatprep.mubr.bf16.mxu0 %v594_v42 }
 0x16b   :  { %763 = vmatmul.mubr.bf16.vlgmr.msra.gmra.mrb[4].mxu0 %v593_v43 }
 0x16c   :  { %v582_v46 = vpop.f32.mrb[0].mxu1 }
 0x16d   :  { %v584_v47 = vpop.f32.mrb[1].mxu1  ;;  %v583_v63 = vadd.f32 %v582_v46, %v171_v61 }
 0x16e   :  { %v586_v48 = vpop.f32.mrb[2].mxu1  ;;  %v585_v0 = vadd.f32 %v584_v47, %v175_v62 }
 0x16f   :  { %v587_v49 = vpop.f32.mrb[3].mxu1  ;;  %v591_v2 = vmax.f32 %v583_v63, 0.0 }
 0x170   :  { %v592_v4 = vmax.f32 %v585_v0, 0.0 }
 0x171   :  { %v908_v6 = vmul.f32 %v901_v3, %v591_v2 }
 0x172   :  { %v909_v7 = vmul.f32 %v905_v5, %v592_v4 }
 0x174   :  { %v910_v8 = vadd.f32 %v909_v7, %v908_v6 }
 0x23e   :  { %v1080_v50 = vpop.f32.mrb[4].mxu0 }
 0x23f   :  { %v1081_v52 = vpop.f32.mrb[5].mxu0 }
 0x240   :  { %v1082_v53 = vadd.f32 %v1081_v52, %v1080_v50  ;;  %v1083_v54 = vpop.f32.mrb[6].mxu0 }
 0x241   :  { %v1084_v55 = vpop.f32.mrb[7].mxu0 }
 0x242   :  { %v765_v56 = vadd.f32 %v1082_v53, %v1037_v51 }
 0x244   :  { %v770_v57 = vmax.f32 %v765_v56, 0.0 }
 0x246   :  { %v771_v58 = vpack.c.bf16 %v770_v57, %v770_v57 }
 0x248   :  { %1112 = vmatmul.mubr.bf16.vlgmr.msra.gmra.mrb[4].mxu1 %v771_v58 }
 0x31b   :  { %v877_v10 = vpop.f32.mrb[4].mxu1 }
 0x31c   :  { %v878_v11 = vadd.f32 %v1054_v9, %v877_v10  ;;  %v1113_v12 = vpop.f32.mrb[5].mxu1 }
 0x31d   :  { %v880_v13 = vpop.f32.mrb[6].mxu1 }
 0x31e   :  { %883 = vst [vmem:[#allocation11] sm:$0xff] %v878_v11  ;;  %884 = vmax.xlane.f32.xlu0 %v878_v11  ;;  %v1114_v14 = vpop.f32.mrb[7].mxu1 }
 0x322   :  { %911 = vadd.xlane.f32.xlu0 %v910_v8 }
 0x3ab   :  { %v885_v16 = vpop.xlane.xlu0 %884 }
 0x3ac   :  { %v886_v17 = vsub.f32 %v878_v11, %v885_v16 }
 0x3ae   :  { %v887_v18 = vmul.f32 1.442695, %v886_v17 }
 0x3af   :  { %v912_v21 = vpop.xlane.xlu0 %911 }
 0x3b0   :  { %1253 = vpow2.f32 %v887_v18  ;;  %v920_v22 = vadd.f32 %v1063_v20, %v912_v21 }
 0x3ba   :  { %v1254_v19 = vpop.eup %1253 }
 0x3bb   :  { %889 = vadd.xlane.f32.xlu1 %v1254_v19 }
 0x3cc   :  { %923 = vperm.xlu1 %1129, %v920_v22  }
 0x3cd   :  { %1356 = shalt.err (!%p1353_p8)
}
 0x3ce   :  { %s1357_s14 = scalar_lea.hbm %s1607_s9, 128 }
 0x3cf   :  { %p1358_p9 = scmp.ne.s32.totalorder %s1607_s9, %s1357_s14  ;;  %p1361_p10 = scmp.lt.u32.totalorder %s1357_s14, %s1607_s9 }
 0x3d1   :  { %p1363_p11 = pnand %p1361_p10, %p1358_p9 }
 0x3d3   :  { %1366 = shalt.err (!%p1363_p11)
}
 0x3d4   :  { %936 = dma.vmem_to_hbm [thread:$0]  %s934_s7, 128, %s1607_s9, [#allocation5]  }
 0x3d5   :  { %s1433_s23 = smov [#allocation12]   ;;  %s1434_s1 = smov [#allocation14]  }
 0x3d6   :  { %s943_s24 = sshll.u32 %s1433_s23, 4  ;;  %s953_s20 = sshll.u32 %s1434_s1, 4  ;;  %s944_s24 = int_to_ptr.vmem [resolvable:$true] %s943_s24  ;;  %s954_s20 = int_to_ptr.vmem [resolvable:$true] %s953_s20 }
 0x3d7   :  { %s1367_s25 = scalar_lea.vmem %s944_s24, 128  ;;  %p1372_p13 = scmp.lt.s32.totalorder %s944_s24, %s944_s24 }
 0x3d8   :  { %p1368_p12 = scmp.ne.s32.totalorder %s944_s24, %s1367_s25  ;;  %p1373_p0 = scmp.lt.s32.totalorder %s1367_s25, %s1367_s25 }
 0x3da   :  { %p1374_p1 = por %p1373_p0, %p1372_p13 }
 0x3dc   :  { %p1375_p2 = pnand %p1374_p1, %p1368_p12 }
 0x448   :  { %v890_v23 = vpop.xlane.xlu1 %889 }
 0x449   :  { %1255 = vlog2.f32 %v890_v23 }
 0x44c   :  { %v924_v24 = vpop.permute.xlu1 %923 }
 0x44d   :  { %926 = vst [vmem:[#allocation14] sm:$0xff] %v924_v24 }
 0x453   :  { %v1256_v25 = vpop.eup %1255 }
 0x454   :  { %v892_v26 = vmul.f32 0.6931472, %v1256_v25 }
 0x456   :  { %v893_v27 = vadd.f32 %v892_v26, %v885_v16 }
 0x458   :  { %v894_v28 = vsub.f32 %v878_v11, %v893_v27 }
 0x45a   :  { %895 = vst [vmem:[#allocation12] sm:$0xff] %v894_v28 }
 0x45b   :  { %1378 = shalt.err (!%p1375_p2)
}
 0x45c   :  { %s1379_s3 = scalar_lea.hbm %s1608_s10, 128 }
 0x45d   :  { %p1380_p3 = scmp.ne.s32.totalorder %s1608_s10, %s1379_s3  ;;  %p1383_p4 = scmp.lt.u32.totalorder %s1379_s3, %s1608_s10 }
 0x45f   :  { %p1385_p5 = pnand %p1383_p4, %p1380_p3 }
 0x461   :  { %1388 = shalt.err (!%p1385_p5)
}
 0x462   :  { %946 = dma.vmem_to_hbm [thread:$0]  %s944_s24, 128, %s1608_s10, [#allocation13]  }
 0x463   :  { %s1389_s29 = scalar_lea.vmem %s954_s20, 128  ;;  %p1394_p7 = scmp.lt.s32.totalorder %s954_s20, %s954_s20 }
 0x464   :  { %p1390_p6 = scmp.ne.s32.totalorder %s954_s20, %s1389_s29  ;;  %p1395_p8 = scmp.lt.s32.totalorder %s1389_s29, %s1389_s29 }
 0x466   :  { %p1396_p9 = por %p1395_p8, %p1394_p7 }
 0x468   :  { %p1397_p10 = pnand %p1396_p9, %p1390_p6 }
 0x46a   :  { %1400 = shalt.err (!%p1397_p10)
}
 0x46b   :  { %s1401_s6 = scalar_lea.hbm %s1609_s11, 128 }
 0x46c   :  { %p1402_p11 = scmp.ne.s32.totalorder %s1609_s11, %s1401_s6  ;;  %p1405_p12 = scmp.lt.u32.totalorder %s1401_s6, %s1609_s11 }
 0x46e   :  { %p1407_p13 = pnand %p1405_p12, %p1402_p11 }
 0x470   :  { %1410 = shalt.err (!%p1407_p13)
}
 0x471   :  { %956 = dma.vmem_to_hbm [thread:$0]  %s954_s20, 128, %s1609_s11, [#allocation13]  }
 0x472   :  { %1417 = dma.done.wait [#allocation5], 128  }
 0x473   :  { %1418 = vsyncadd [#allocation5], 4294967168 }
 0x474   :  { %1419 = dma.done.wait [#allocation13], 256  }
 0x475   :  { %1420 = vsyncadd [#allocation13], 4294967040 }
 0x476   :  { %966 = vsyncpa [#allocation4], 1 }
 0x477   :  { %967 = vsyncpa [#allocation7], 1 }
 0x478   :  { %968 = vsyncpa [#allocation10], 1 }
 0x479   :  { %969 = vsyncpa [#allocation5], 1 }
 0x47a   :  { %970 = vsyncpa [#allocation13], 1 }

</bundles_post_ra>
